<compile_context>
chip_gen: v7x
topology: tpu7x:2x2x1
jax: 0.10.0
libtpu: 0.0.40
codegen_flags: <defaults>
</compile_context>

<pallas_src>
import jax
import jax.numpy as jnp
from jax.experimental import pallas as pl
from jax.experimental.pallas import tpu as pltpu


def agshrink_kernel(x_ref, w1_ref, shift_ref, w2_ref, b2_ref, o_ref):
    """One (Bblk, C, tm) column tile -> (Bblk, Cout, tm) output tile.

    x_ref / o_ref live in VMEM; w1/shift/w2/b2 live in SMEM and are read as
    scalars, so both 1x1 convs become scalar-broadcast VPU FMAs.
    """
    _, C, _ = x_ref.shape
    Cout = o_ref.shape[1]

    # Upcast once to f32 for the elementwise/FMA work (bf16 I/O only saves DMA).
    xs = [x_ref[:, c, :].astype(jnp.float32) for c in range(C)]   # C x (Bblk, tm)

    # Stage 1: h[o] = relu( sum_c W1[o,c] * x[c] + shift[o] )
    # (BN inference scale already folded into W1; shift = beta - mean*scale.)
    hs = []
    for o in range(C):
        acc = w1_ref[o, 0] * xs[0] + shift_ref[o]
        for c in range(1, C):
            acc = acc + w1_ref[o, c] * xs[c]
        hs.append(jnp.maximum(acc, 0.0))

    # Dropout: identity in eval mode.

    # Stage 2: y[k] = sum_c W2[k,c] * h[c] + b2[k]; lane-dense stores.
    for k in range(Cout):
        acc = w2_ref[k, 0] * hs[0] + b2_ref[k]
        for c in range(1, C):
            acc = acc + w2_ref[k, c] * hs[c]
        o_ref[:, k, :] = acc.astype(o_ref.dtype)


def _round_up(n, m):
    return ((n + m - 1) // m) * m


def _largest_divisor_leq(n, k):
    k = max(1, min(n, k))
    while n % k != 0:
        k -= 1
    return k


def agshrink_forward(x, params, *, tm=32768, io_dtype=None):
    """x: (B, C_in, T, V).  Returns (B, C_out, T, sqrt(V), sqrt(V))."""
    B, C, T, V = x.shape
    V_view = int(V ** 0.5)
    assert V_view * V_view == V, "V must be a perfect square"

    w1 = params["conv_w"]          # (Cin, Cin, 1, 1)
    gamma = params["bn_gamma"]     # (Cin,)
    beta = params["bn_beta"]       # (Cin,)
    mean = params["bn_mean"]       # (Cin,)
    var = params["bn_var"]         # (Cin,)
    eps = params["bn_eps"]
    w2 = params["shrink_w"]        # (Cout, Cin, 1, 1)
    b2 = params["shrink_b"]        # (Cout,)
    Cout = w2.shape[0]

    if io_dtype is None:
        io_dtype = x.dtype
    io_dtype = jnp.dtype(io_dtype)

    # Fold BN (inference) scale into the first 1x1 conv's weight; keep shift.
    scale = (gamma / jnp.sqrt(var + eps)).astype(jnp.float32)    # (Cin,)
    w1_scaled = (w1[:, :, 0, 0] * scale[:, None]).astype(jnp.float32)  # (Cin, Cin)
    shift = (beta - mean * scale).astype(jnp.float32)            # (Cin,)
    w2_mat = w2[:, :, 0, 0].astype(jnp.float32)                  # (Cout, Cin)
    b2_vec = b2.astype(jnp.float32)                              # (Cout,)

    # Free view: (B, C, T, V) -> (B, C, M); no transposes.
    M = T * V
    x_cols = x.reshape(B, C, M).astype(io_dtype)

    # ---- tiling: large lane-dense column tiles; block over batch if M small.
    tm = max(128, _round_up(tm, 128))
    if tm >= M:
        tm_eff = M                                    # full column extent
        bblk = _largest_divisor_leq(B, max(1, tm // max(M, 1)))
    else:
        tm_eff = tm                                   # multiple of 128
        bblk = 1

    n_b = pl.cdiv(B, bblk)
    n_m = pl.cdiv(M, tm_eff)
    # Keep >=2 parallel grid steps when possible (v7x: feed both TensorCores).
    if n_b * n_m < 2:
        if bblk > 1:
            bblk = _largest_divisor_leq(B, max(1, bblk // 2))
        elif B == 1 and M > 256 and tm_eff >= M:
            tm_eff = _round_up(pl.cdiv(M, 2), 128)
    n_b = pl.cdiv(B, bblk)
    n_m = pl.cdiv(M, tm_eff)
    grid = (n_b, n_m)

    dsize = io_dtype.itemsize
    cost = pl.CostEstimate(
        flops=2 * B * M * C * (C + Cout),
        transcendentals=0,
        bytes_accessed=B * M * (C + Cout) * dsize
        + (C * C + Cout * C + C + Cout) * 4,
    )

    smem_spec = pl.BlockSpec(memory_space=pltpu.MemorySpace.SMEM)

    out = pl.pallas_call(
        agshrink_kernel,
        out_shape=jax.ShapeDtypeStruct((B, Cout, M), io_dtype),
        grid_spec=pltpu.PrefetchScalarGridSpec(
            num_scalar_prefetch=0,
            grid=grid,
            in_specs=[
                pl.BlockSpec((bblk, C, tm_eff),
                             lambda bi, j: (bi, 0, j)),   # x column tile (VMEM)
                smem_spec,                                # W1 (BN-scaled), SMEM
                smem_spec,                                # BN shift, SMEM
                smem_spec,                                # W2, SMEM
                smem_spec,                                # bias, SMEM
            ],
            out_specs=pl.BlockSpec((bblk, Cout, tm_eff),
                                   lambda bi, j: (bi, 0, j)),
        ),
        compiler_params=pltpu.CompilerParams(
            dimension_semantics=("parallel", "parallel"),
            vmem_limit_bytes=64 * 1024 * 1024),
        cost_estimate=cost,
    )(x_cols, w1_scaled, shift, w2_mat, b2_vec)

    # Free view back to the module's output shape.
    return out.reshape(B, Cout, T, V_view, V_view)


def make_params(key, in_channels, out_channels):
    k1, k2, k3, k4, k5, k6, k7 = jax.random.split(key, 7)
    return {
        "conv_w": jax.random.normal(k1, (in_channels, in_channels, 1, 1),
                                    jnp.float32) * 0.1,
        "bn_gamma": jnp.ones((in_channels,), jnp.float32)
                    + 0.05 * jax.random.normal(k2, (in_channels,), jnp.float32),
        "bn_beta": 0.05 * jax.random.normal(k3, (in_channels,), jnp.float32),
        "bn_mean": 0.1 * jax.random.normal(k4, (in_channels,), jnp.float32),
        "bn_var": jnp.abs(jax.random.normal(k5, (in_channels,), jnp.float32)) + 0.5,
        "bn_eps": 1e-5,
        "shrink_w": jax.random.normal(k6, (out_channels, in_channels, 1, 1),
                                      jnp.float32) * 0.1,
        "shrink_b": 0.05 * jax.random.normal(k7, (out_channels,), jnp.float32),
    }


def _reference(x, p):
    """Pure-JAX reference of the eval-mode forward, for a sanity check."""
    B, C, T, V = x.shape
    Vv = int(V ** 0.5)
    hi = jax.lax.Precision.HIGHEST
    w1 = p["conv_w"][:, :, 0, 0]
    h = jnp.einsum("oc,bctv->botv", w1, x, precision=hi)
    scale = p["bn_gamma"] / jnp.sqrt(p["bn_var"] + p["bn_eps"])
    shift = p["bn_beta"] - p["bn_mean"] * scale
    h = h * scale[None, :, None, None] + shift[None, :, None, None]
    h = jnp.maximum(h, 0.0)
    w2 = p["shrink_w"][:, :, 0, 0]
    y = jnp.einsum("oc,bctv->botv", w2, h, precision=hi)
    y = y + p["shrink_b"][None, :, None, None]
    return y.reshape(B, -1, T, Vv, Vv)


if __name__ == "__main__":
    key = jax.random.PRNGKey(0)
    kx, kp = jax.random.split(key)

    B, Cin, Cout, T, V = 2, 4, 6, 8, 16   # V = 16 -> V_view = 4
    x = jax.random.normal(kx, (B, Cin, T, V), jnp.float32)
    params = make_params(kp, Cin, Cout)

    ref = _reference(x, params)

    # f32 HBM I/O path (exact check).
    out = jax.block_until_ready(agshrink_forward(x, params))
    assert out.shape == (B, Cout, T, 4, 4), out.shape
    assert jnp.allclose(out, ref, atol=1e-5, rtol=1e-5), \
        float(jnp.max(jnp.abs(out - ref)))

    # bf16 HBM I/O path (halves DMA traffic; looser tolerance for bf16 rounding).
    out_bf16 = jax.block_until_ready(
        agshrink_forward(x, params, io_dtype=jnp.bfloat16))
    assert out_bf16.shape == (B, Cout, T, 4, 4), out_bf16.shape
    assert float(jnp.max(jnp.abs(out_bf16.astype(jnp.float32) - ref))) < 0.1

    print("KERNEL_OK")
</pallas_src>

<mosaic_0001>
module attributes {stable_mosaic.version = 11 : i64} {
  func.func @agshrink_kernel(%arg0: i32, %arg1: i32, %arg2: memref<1x4x128xf32, #tpu.memory_space<vmem>>, %arg3: memref<4x4xf32, #tpu.memory_space<smem>>, %arg4: memref<4xf32, #tpu.memory_space<smem>>, %arg5: memref<6x4xf32, #tpu.memory_space<smem>>, %arg6: memref<6xf32, #tpu.memory_space<smem>>, %arg7: memref<1x6x128xf32, #tpu.memory_space<vmem>>) attributes {dimension_semantics = [#tpu.dimension_semantics<parallel>, #tpu.dimension_semantics<parallel>], iteration_bounds = array<i64: 2, 1>, scalar_prefetch = 0 : i64, scratch_operands = 0 : i64, tpu.core_type = #tpu.core_type<tc>, window_params = [{transform_indices = @transform_0, window_bounds = array<i64: 1, 4, 128>}, {transform_indices = @transform_1, window_bounds = array<i64: 4, 4>}, {transform_indices = @transform_2, window_bounds = array<i64: 4>}, {transform_indices = @transform_3, window_bounds = array<i64: 6, 4>}, {transform_indices = @transform_4, window_bounds = array<i64: 6>}, {transform_indices = @transform_5, window_bounds = array<i64: 1, 6, 128>}]} {
    %c0 = arith.constant 0 : index
    %c0_0 = arith.constant 0 : index
    %c0_1 = arith.constant 0 : index
    %0 = vector.load %arg2[%c0, %c0_0, %c0_1] : memref<1x4x128xf32, #tpu.memory_space<vmem>>, vector<1x1x128xf32>
    %1 = vector.shape_cast %0 : vector<1x1x128xf32> to vector<1x128xf32>
    %c0_2 = arith.constant 0 : index
    %c1 = arith.constant 1 : index
    %c0_3 = arith.constant 0 : index
    %2 = vector.load %arg2[%c0_2, %c1, %c0_3] : memref<1x4x128xf32, #tpu.memory_space<vmem>>, vector<1x1x128xf32>
    %3 = vector.shape_cast %2 : vector<1x1x128xf32> to vector<1x128xf32>
    %c0_4 = arith.constant 0 : index
    %c2 = arith.constant 2 : index
    %c0_5 = arith.constant 0 : index
    %4 = vector.load %arg2[%c0_4, %c2, %c0_5] : memref<1x4x128xf32, #tpu.memory_space<vmem>>, vector<1x1x128xf32>
    %5 = vector.shape_cast %4 : vector<1x1x128xf32> to vector<1x128xf32>
    %c0_6 = arith.constant 0 : index
    %c3 = arith.constant 3 : index
    %c0_7 = arith.constant 0 : index
    %6 = vector.load %arg2[%c0_6, %c3, %c0_7] : memref<1x4x128xf32, #tpu.memory_space<vmem>>, vector<1x1x128xf32>
    %7 = vector.shape_cast %6 : vector<1x1x128xf32> to vector<1x128xf32>
    %c0_8 = arith.constant 0 : index
    %c0_9 = arith.constant 0 : index
    %8 = memref.load %arg3[%c0_8, %c0_9] : memref<4x4xf32, #tpu.memory_space<smem>>
    %9 = vector.broadcast %8 : f32 to vector<1x128xf32>
    %10 = arith.mulf %9, %1 : vector<1x128xf32>
    %c0_10 = arith.constant 0 : index
    %11 = memref.load %arg4[%c0_10] : memref<4xf32, #tpu.memory_space<smem>>
    %12 = vector.broadcast %11 : f32 to vector<1x128xf32>
    %13 = arith.addf %10, %12 : vector<1x128xf32>
    %c0_11 = arith.constant 0 : index
    %c1_12 = arith.constant 1 : index
    %14 = memref.load %arg3[%c0_11, %c1_12] : memref<4x4xf32, #tpu.memory_space<smem>>
    %15 = vector.broadcast %14 : f32 to vector<1x128xf32>
    %16 = arith.mulf %15, %3 : vector<1x128xf32>
    %17 = arith.addf %13, %16 : vector<1x128xf32>
    %c0_13 = arith.constant 0 : index
    %c2_14 = arith.constant 2 : index
    %18 = memref.load %arg3[%c0_13, %c2_14] : memref<4x4xf32, #tpu.memory_space<smem>>
    %19 = vector.broadcast %18 : f32 to vector<1x128xf32>
    %20 = arith.mulf %19, %5 : vector<1x128xf32>
    %21 = arith.addf %17, %20 : vector<1x128xf32>
    %c0_15 = arith.constant 0 : index
    %c3_16 = arith.constant 3 : index
    %22 = memref.load %arg3[%c0_15, %c3_16] : memref<4x4xf32, #tpu.memory_space<smem>>
    %23 = vector.broadcast %22 : f32 to vector<1x128xf32>
    %24 = arith.mulf %23, %7 : vector<1x128xf32>
    %25 = arith.addf %21, %24 : vector<1x128xf32>
    %cst = arith.constant 0.000000e+00 : f32
    %26 = vector.broadcast %cst : f32 to vector<1x128xf32>
    %27 = arith.maximumf %25, %26 : vector<1x128xf32>
    %c1_17 = arith.constant 1 : index
    %c0_18 = arith.constant 0 : index
    %28 = memref.load %arg3[%c1_17, %c0_18] : memref<4x4xf32, #tpu.memory_space<smem>>
    %29 = vector.broadcast %28 : f32 to vector<1x128xf32>
    %30 = arith.mulf %29, %1 : vector<1x128xf32>
    %c1_19 = arith.constant 1 : index
    %31 = memref.load %arg4[%c1_19] : memref<4xf32, #tpu.memory_space<smem>>
    %32 = vector.broadcast %31 : f32 to vector<1x128xf32>
    %33 = arith.addf %30, %32 : vector<1x128xf32>
    %c1_20 = arith.constant 1 : index
    %c1_21 = arith.constant 1 : index
    %34 = memref.load %arg3[%c1_20, %c1_21] : memref<4x4xf32, #tpu.memory_space<smem>>
    %35 = vector.broadcast %34 : f32 to vector<1x128xf32>
    %36 = arith.mulf %35, %3 : vector<1x128xf32>
    %37 = arith.addf %33, %36 : vector<1x128xf32>
    %c1_22 = arith.constant 1 : index
    %c2_23 = arith.constant 2 : index
    %38 = memref.load %arg3[%c1_22, %c2_23] : memref<4x4xf32, #tpu.memory_space<smem>>
    %39 = vector.broadcast %38 : f32 to vector<1x128xf32>
    %40 = arith.mulf %39, %5 : vector<1x128xf32>
    %41 = arith.addf %37, %40 : vector<1x128xf32>
    %c1_24 = arith.constant 1 : index
    %c3_25 = arith.constant 3 : index
    %42 = memref.load %arg3[%c1_24, %c3_25] : memref<4x4xf32, #tpu.memory_space<smem>>
    %43 = vector.broadcast %42 : f32 to vector<1x128xf32>
    %44 = arith.mulf %43, %7 : vector<1x128xf32>
    %45 = arith.addf %41, %44 : vector<1x128xf32>
    %cst_26 = arith.constant 0.000000e+00 : f32
    %46 = vector.broadcast %cst_26 : f32 to vector<1x128xf32>
    %47 = arith.maximumf %45, %46 : vector<1x128xf32>
    %c2_27 = arith.constant 2 : index
    %c0_28 = arith.constant 0 : index
    %48 = memref.load %arg3[%c2_27, %c0_28] : memref<4x4xf32, #tpu.memory_space<smem>>
    %49 = vector.broadcast %48 : f32 to vector<1x128xf32>
    %50 = arith.mulf %49, %1 : vector<1x128xf32>
    %c2_29 = arith.constant 2 : index
    %51 = memref.load %arg4[%c2_29] : memref<4xf32, #tpu.memory_space<smem>>
    %52 = vector.broadcast %51 : f32 to vector<1x128xf32>
    %53 = arith.addf %50, %52 : vector<1x128xf32>
    %c2_30 = arith.constant 2 : index
    %c1_31 = arith.constant 1 : index
    %54 = memref.load %arg3[%c2_30, %c1_31] : memref<4x4xf32, #tpu.memory_space<smem>>
    %55 = vector.broadcast %54 : f32 to vector<1x128xf32>
    %56 = arith.mulf %55, %3 : vector<1x128xf32>
    %57 = arith.addf %53, %56 : vector<1x128xf32>
    %c2_32 = arith.constant 2 : index
    %c2_33 = arith.constant 2 : index
    %58 = memref.load %arg3[%c2_32, %c2_33] : memref<4x4xf32, #tpu.memory_space<smem>>
    %59 = vector.broadcast %58 : f32 to vector<1x128xf32>
    %60 = arith.mulf %59, %5 : vector<1x128xf32>
    %61 = arith.addf %57, %60 : vector<1x128xf32>
    %c2_34 = arith.constant 2 : index
    %c3_35 = arith.constant 3 : index
    %62 = memref.load %arg3[%c2_34, %c3_35] : memref<4x4xf32, #tpu.memory_space<smem>>
    %63 = vector.broadcast %62 : f32 to vector<1x128xf32>
    %64 = arith.mulf %63, %7 : vector<1x128xf32>
    %65 = arith.addf %61, %64 : vector<1x128xf32>
    %cst_36 = arith.constant 0.000000e+00 : f32
    %66 = vector.broadcast %cst_36 : f32 to vector<1x128xf32>
    %67 = arith.maximumf %65, %66 : vector<1x128xf32>
    %c3_37 = arith.constant 3 : index
    %c0_38 = arith.constant 0 : index
    %68 = memref.load %arg3[%c3_37, %c0_38] : memref<4x4xf32, #tpu.memory_space<smem>>
    %69 = vector.broadcast %68 : f32 to vector<1x128xf32>
    %70 = arith.mulf %69, %1 : vector<1x128xf32>
    %c3_39 = arith.constant 3 : index
    %71 = memref.load %arg4[%c3_39] : memref<4xf32, #tpu.memory_space<smem>>
    %72 = vector.broadcast %71 : f32 to vector<1x128xf32>
    %73 = arith.addf %70, %72 : vector<1x128xf32>
    %c3_40 = arith.constant 3 : index
    %c1_41 = arith.constant 1 : index
    %74 = memref.load %arg3[%c3_40, %c1_41] : memref<4x4xf32, #tpu.memory_space<smem>>
    %75 = vector.broadcast %74 : f32 to vector<1x128xf32>
    %76 = arith.mulf %75, %3 : vector<1x128xf32>
    %77 = arith.addf %73, %76 : vector<1x128xf32>
    %c3_42 = arith.constant 3 : index
    %c2_43 = arith.constant 2 : index
    %78 = memref.load %arg3[%c3_42, %c2_43] : memref<4x4xf32, #tpu.memory_space<smem>>
    %79 = vector.broadcast %78 : f32 to vector<1x128xf32>
    %80 = arith.mulf %79, %5 : vector<1x128xf32>
    %81 = arith.addf %77, %80 : vector<1x128xf32>
    %c3_44 = arith.constant 3 : index
    %c3_45 = arith.constant 3 : index
    %82 = memref.load %arg3[%c3_44, %c3_45] : memref<4x4xf32, #tpu.memory_space<smem>>
    %83 = vector.broadcast %82 : f32 to vector<1x128xf32>
    %84 = arith.mulf %83, %7 : vector<1x128xf32>
    %85 = arith.addf %81, %84 : vector<1x128xf32>
    %cst_46 = arith.constant 0.000000e+00 : f32
    %86 = vector.broadcast %cst_46 : f32 to vector<1x128xf32>
    %87 = arith.maximumf %85, %86 : vector<1x128xf32>
    %c0_47 = arith.constant 0 : index
    %c0_48 = arith.constant 0 : index
    %88 = memref.load %arg5[%c0_47, %c0_48] : memref<6x4xf32, #tpu.memory_space<smem>>
    %89 = vector.broadcast %88 : f32 to vector<1x128xf32>
    %90 = arith.mulf %89, %27 : vector<1x128xf32>
    %c0_49 = arith.constant 0 : index
    %91 = memref.load %arg6[%c0_49] : memref<6xf32, #tpu.memory_space<smem>>
    %92 = vector.broadcast %91 : f32 to vector<1x128xf32>
    %93 = arith.addf %90, %92 : vector<1x128xf32>
    %c0_50 = arith.constant 0 : index
    %c1_51 = arith.constant 1 : index
    %94 = memref.load %arg5[%c0_50, %c1_51] : memref<6x4xf32, #tpu.memory_space<smem>>
    %95 = vector.broadcast %94 : f32 to vector<1x128xf32>
    %96 = arith.mulf %95, %47 : vector<1x128xf32>
    %97 = arith.addf %93, %96 : vector<1x128xf32>
    %c0_52 = arith.constant 0 : index
    %c2_53 = arith.constant 2 : index
    %98 = memref.load %arg5[%c0_52, %c2_53] : memref<6x4xf32, #tpu.memory_space<smem>>
    %99 = vector.broadcast %98 : f32 to vector<1x128xf32>
    %100 = arith.mulf %99, %67 : vector<1x128xf32>
    %101 = arith.addf %97, %100 : vector<1x128xf32>
    %c0_54 = arith.constant 0 : index
    %c3_55 = arith.constant 3 : index
    %102 = memref.load %arg5[%c0_54, %c3_55] : memref<6x4xf32, #tpu.memory_space<smem>>
    %103 = vector.broadcast %102 : f32 to vector<1x128xf32>
    %104 = arith.mulf %103, %87 : vector<1x128xf32>
    %105 = arith.addf %101, %104 : vector<1x128xf32>
    %c0_56 = arith.constant 0 : index
    %c0_57 = arith.constant 0 : index
    %c0_58 = arith.constant 0 : index
    %106 = vector.load %arg7[%c0_56, %c0_57, %c0_58] : memref<1x6x128xf32, #tpu.memory_space<vmem>>, vector<1x1x128xf32>
    %107 = vector.shape_cast %106 : vector<1x1x128xf32> to vector<1x128xf32>
    %108 = vector.shape_cast %105 : vector<1x128xf32> to vector<1x1x128xf32>
    tpu.vector_store %arg7[%c0_56, %c0_57, %c0_58], %108 {strides = array<i32>} : memref<1x6x128xf32, #tpu.memory_space<vmem>>, vector<1x1x128xf32>,
    %c1_59 = arith.constant 1 : index
    %c0_60 = arith.constant 0 : index
    %109 = memref.load %arg5[%c1_59, %c0_60] : memref<6x4xf32, #tpu.memory_space<smem>>
    %110 = vector.broadcast %109 : f32 to vector<1x128xf32>
    %111 = arith.mulf %110, %27 : vector<1x128xf32>
    %c1_61 = arith.constant 1 : index
    %112 = memref.load %arg6[%c1_61] : memref<6xf32, #tpu.memory_space<smem>>
    %113 = vector.broadcast %112 : f32 to vector<1x128xf32>
    %114 = arith.addf %111, %113 : vector<1x128xf32>
    %c1_62 = arith.constant 1 : index
    %c1_63 = arith.constant 1 : index
    %115 = memref.load %arg5[%c1_62, %c1_63] : memref<6x4xf32, #tpu.memory_space<smem>>
    %116 = vector.broadcast %115 : f32 to vector<1x128xf32>
    %117 = arith.mulf %116, %47 : vector<1x128xf32>
    %118 = arith.addf %114, %117 : vector<1x128xf32>
    %c1_64 = arith.constant 1 : index
    %c2_65 = arith.constant 2 : index
    %119 = memref.load %arg5[%c1_64, %c2_65] : memref<6x4xf32, #tpu.memory_space<smem>>
    %120 = vector.broadcast %119 : f32 to vector<1x128xf32>
    %121 = arith.mulf %120, %67 : vector<1x128xf32>
    %122 = arith.addf %118, %121 : vector<1x128xf32>
    %c1_66 = arith.constant 1 : index
    %c3_67 = arith.constant 3 : index
    %123 = memref.load %arg5[%c1_66, %c3_67] : memref<6x4xf32, #tpu.memory_space<smem>>
    %124 = vector.broadcast %123 : f32 to vector<1x128xf32>
    %125 = arith.mulf %124, %87 : vector<1x128xf32>
    %126 = arith.addf %122, %125 : vector<1x128xf32>
    %c0_68 = arith.constant 0 : index
    %c1_69 = arith.constant 1 : index
    %c0_70 = arith.constant 0 : index
    %127 = vector.load %arg7[%c0_68, %c1_69, %c0_70] : memref<1x6x128xf32, #tpu.memory_space<vmem>>, vector<1x1x128xf32>
    %128 = vector.shape_cast %127 : vector<1x1x128xf32> to vector<1x128xf32>
    %129 = vector.shape_cast %126 : vector<1x128xf32> to vector<1x1x128xf32>
    tpu.vector_store %arg7[%c0_68, %c1_69, %c0_70], %129 {strides = array<i32>} : memref<1x6x128xf32, #tpu.memory_space<vmem>>, vector<1x1x128xf32>,
    %c2_71 = arith.constant 2 : index
    %c0_72 = arith.constant 0 : index
    %130 = memref.load %arg5[%c2_71, %c0_72] : memref<6x4xf32, #tpu.memory_space<smem>>
    %131 = vector.broadcast %130 : f32 to vector<1x128xf32>
    %132 = arith.mulf %131, %27 : vector<1x128xf32>
    %c2_73 = arith.constant 2 : index
    %133 = memref.load %arg6[%c2_73] : memref<6xf32, #tpu.memory_space<smem>>
    %134 = vector.broadcast %133 : f32 to vector<1x128xf32>
    %135 = arith.addf %132, %134 : vector<1x128xf32>
    %c2_74 = arith.constant 2 : index
    %c1_75 = arith.constant 1 : index
    %136 = memref.load %arg5[%c2_74, %c1_75] : memref<6x4xf32, #tpu.memory_space<smem>>
    %137 = vector.broadcast %136 : f32 to vector<1x128xf32>
    %138 = arith.mulf %137, %47 : vector<1x128xf32>
    %139 = arith.addf %135, %138 : vector<1x128xf32>
    %c2_76 = arith.constant 2 : index
    %c2_77 = arith.constant 2 : index
    %140 = memref.load %arg5[%c2_76, %c2_77] : memref<6x4xf32, #tpu.memory_space<smem>>
    %141 = vector.broadcast %140 : f32 to vector<1x128xf32>
    %142 = arith.mulf %141, %67 : vector<1x128xf32>
    %143 = arith.addf %139, %142 : vector<1x128xf32>
    %c2_78 = arith.constant 2 : index
    %c3_79 = arith.constant 3 : index
    %144 = memref.load %arg5[%c2_78, %c3_79] : memref<6x4xf32, #tpu.memory_space<smem>>
    %145 = vector.broadcast %144 : f32 to vector<1x128xf32>
    %146 = arith.mulf %145, %87 : vector<1x128xf32>
    %147 = arith.addf %143, %146 : vector<1x128xf32>
    %c0_80 = arith.constant 0 : index
    %c2_81 = arith.constant 2 : index
    %c0_82 = arith.constant 0 : index
    %148 = vector.load %arg7[%c0_80, %c2_81, %c0_82] : memref<1x6x128xf32, #tpu.memory_space<vmem>>, vector<1x1x128xf32>
    %149 = vector.shape_cast %148 : vector<1x1x128xf32> to vector<1x128xf32>
    %150 = vector.shape_cast %147 : vector<1x128xf32> to vector<1x1x128xf32>
    tpu.vector_store %arg7[%c0_80, %c2_81, %c0_82], %150 {strides = array<i32>} : memref<1x6x128xf32, #tpu.memory_space<vmem>>, vector<1x1x128xf32>,
    %c3_83 = arith.constant 3 : index
    %c0_84 = arith.constant 0 : index
    %151 = memref.load %arg5[%c3_83, %c0_84] : memref<6x4xf32, #tpu.memory_space<smem>>
    %152 = vector.broadcast %151 : f32 to vector<1x128xf32>
    %153 = arith.mulf %152, %27 : vector<1x128xf32>
    %c3_85 = arith.constant 3 : index
    %154 = memref.load %arg6[%c3_85] : memref<6xf32, #tpu.memory_space<smem>>
    %155 = vector.broadcast %154 : f32 to vector<1x128xf32>
    %156 = arith.addf %153, %155 : vector<1x128xf32>
    %c3_86 = arith.constant 3 : index
    %c1_87 = arith.constant 1 : index
    %157 = memref.load %arg5[%c3_86, %c1_87] : memref<6x4xf32, #tpu.memory_space<smem>>
    %158 = vector.broadcast %157 : f32 to vector<1x128xf32>
    %159 = arith.mulf %158, %47 : vector<1x128xf32>
    %160 = arith.addf %156, %159 : vector<1x128xf32>
    %c3_88 = arith.constant 3 : index
    %c2_89 = arith.constant 2 : index
    %161 = memref.load %arg5[%c3_88, %c2_89] : memref<6x4xf32, #tpu.memory_space<smem>>
    %162 = vector.broadcast %161 : f32 to vector<1x128xf32>
    %163 = arith.mulf %162, %67 : vector<1x128xf32>
    %164 = arith.addf %160, %163 : vector<1x128xf32>
    %c3_90 = arith.constant 3 : index
    %c3_91 = arith.constant 3 : index
    %165 = memref.load %arg5[%c3_90, %c3_91] : memref<6x4xf32, #tpu.memory_space<smem>>
    %166 = vector.broadcast %165 : f32 to vector<1x128xf32>
    %167 = arith.mulf %166, %87 : vector<1x128xf32>
    %168 = arith.addf %164, %167 : vector<1x128xf32>
    %c0_92 = arith.constant 0 : index
    %c3_93 = arith.constant 3 : index
    %c0_94 = arith.constant 0 : index
    %169 = vector.load %arg7[%c0_92, %c3_93, %c0_94] : memref<1x6x128xf32, #tpu.memory_space<vmem>>, vector<1x1x128xf32>
    %170 = vector.shape_cast %169 : vector<1x1x128xf32> to vector<1x128xf32>
    %171 = vector.shape_cast %168 : vector<1x128xf32> to vector<1x1x128xf32>
    tpu.vector_store %arg7[%c0_92, %c3_93, %c0_94], %171 {strides = array<i32>} : memref<1x6x128xf32, #tpu.memory_space<vmem>>, vector<1x1x128xf32>,
    %c4 = arith.constant 4 : index
    %c0_95 = arith.constant 0 : index
    %172 = memref.load %arg5[%c4, %c0_95] : memref<6x4xf32, #tpu.memory_space<smem>>
    %173 = vector.broadcast %172 : f32 to vector<1x128xf32>
    %174 = arith.mulf %173, %27 : vector<1x128xf32>
    %c4_96 = arith.constant 4 : index
    %175 = memref.load %arg6[%c4_96] : memref<6xf32, #tpu.memory_space<smem>>
    %176 = vector.broadcast %175 : f32 to vector<1x128xf32>
    %177 = arith.addf %174, %176 : vector<1x128xf32>
    %c4_97 = arith.constant 4 : index
    %c1_98 = arith.constant 1 : index
    %178 = memref.load %arg5[%c4_97, %c1_98] : memref<6x4xf32, #tpu.memory_space<smem>>
    %179 = vector.broadcast %178 : f32 to vector<1x128xf32>
    %180 = arith.mulf %179, %47 : vector<1x128xf32>
    %181 = arith.addf %177, %180 : vector<1x128xf32>
    %c4_99 = arith.constant 4 : index
    %c2_100 = arith.constant 2 : index
    %182 = memref.load %arg5[%c4_99, %c2_100] : memref<6x4xf32, #tpu.memory_space<smem>>
    %183 = vector.broadcast %182 : f32 to vector<1x128xf32>
    %184 = arith.mulf %183, %67 : vector<1x128xf32>
    %185 = arith.addf %181, %184 : vector<1x128xf32>
    %c4_101 = arith.constant 4 : index
    %c3_102 = arith.constant 3 : index
    %186 = memref.load %arg5[%c4_101, %c3_102] : memref<6x4xf32, #tpu.memory_space<smem>>
    %187 = vector.broadcast %186 : f32 to vector<1x128xf32>
    %188 = arith.mulf %187, %87 : vector<1x128xf32>
    %189 = arith.addf %185, %188 : vector<1x128xf32>
    %c0_103 = arith.constant 0 : index
    %c4_104 = arith.constant 4 : index
    %c0_105 = arith.constant 0 : index
    %190 = vector.load %arg7[%c0_103, %c4_104, %c0_105] : memref<1x6x128xf32, #tpu.memory_space<vmem>>, vector<1x1x128xf32>
    %191 = vector.shape_cast %190 : vector<1x1x128xf32> to vector<1x128xf32>
    %192 = vector.shape_cast %189 : vector<1x128xf32> to vector<1x1x128xf32>
    tpu.vector_store %arg7[%c0_103, %c4_104, %c0_105], %192 {strides = array<i32>} : memref<1x6x128xf32, #tpu.memory_space<vmem>>, vector<1x1x128xf32>,
    %c5 = arith.constant 5 : index
    %c0_106 = arith.constant 0 : index
    %193 = memref.load %arg5[%c5, %c0_106] : memref<6x4xf32, #tpu.memory_space<smem>>
    %194 = vector.broadcast %193 : f32 to vector<1x128xf32>
    %195 = arith.mulf %194, %27 : vector<1x128xf32>
    %c5_107 = arith.constant 5 : index
    %196 = memref.load %arg6[%c5_107] : memref<6xf32, #tpu.memory_space<smem>>
    %197 = vector.broadcast %196 : f32 to vector<1x128xf32>
    %198 = arith.addf %195, %197 : vector<1x128xf32>
    %c5_108 = arith.constant 5 : index
    %c1_109 = arith.constant 1 : index
    %199 = memref.load %arg5[%c5_108, %c1_109] : memref<6x4xf32, #tpu.memory_space<smem>>
    %200 = vector.broadcast %199 : f32 to vector<1x128xf32>
    %201 = arith.mulf %200, %47 : vector<1x128xf32>
    %202 = arith.addf %198, %201 : vector<1x128xf32>
    %c5_110 = arith.constant 5 : index
    %c2_111 = arith.constant 2 : index
    %203 = memref.load %arg5[%c5_110, %c2_111] : memref<6x4xf32, #tpu.memory_space<smem>>
    %204 = vector.broadcast %203 : f32 to vector<1x128xf32>
    %205 = arith.mulf %204, %67 : vector<1x128xf32>
    %206 = arith.addf %202, %205 : vector<1x128xf32>
    %c5_112 = arith.constant 5 : index
    %c3_113 = arith.constant 3 : index
    %207 = memref.load %arg5[%c5_112, %c3_113] : memref<6x4xf32, #tpu.memory_space<smem>>
    %208 = vector.broadcast %207 : f32 to vector<1x128xf32>
    %209 = arith.mulf %208, %87 : vector<1x128xf32>
    %210 = arith.addf %206, %209 : vector<1x128xf32>
    %c0_114 = arith.constant 0 : index
    %c5_115 = arith.constant 5 : index
    %c0_116 = arith.constant 0 : index
    %211 = vector.load %arg7[%c0_114, %c5_115, %c0_116] : memref<1x6x128xf32, #tpu.memory_space<vmem>>, vector<1x1x128xf32>
    %212 = vector.shape_cast %211 : vector<1x1x128xf32> to vector<1x128xf32>
    %213 = vector.shape_cast %210 : vector<1x128xf32> to vector<1x1x128xf32>
    tpu.vector_store %arg7[%c0_114, %c5_115, %c0_116], %213 {strides = array<i32>} : memref<1x6x128xf32, #tpu.memory_space<vmem>>, vector<1x1x128xf32>,
    return
  }
  func.func @transform_0(%arg0: i32, %arg1: i32) -> (i32, i32, i32) {
    %c0_i32 = arith.constant 0 : i32
    %c0_i32_0 = arith.constant 0 : i32
    return %arg0, %c0_i32, %arg1 : i32, i32, i32
  }
  func.func @transform_1(%arg0: i32, %arg1: i32) -> (i32, i32) {
    %c0_i32 = arith.constant 0 : i32
    %c0_i32_0 = arith.constant 0 : i32
    %c0_i32_1 = arith.constant 0 : i32
    return %c0_i32, %c0_i32_0 : i32, i32
  }
  func.func @transform_2(%arg0: i32, %arg1: i32) -> i32 {
    %c0_i32 = arith.constant 0 : i32
    %c0_i32_0 = arith.constant 0 : i32
    return %c0_i32 : i32
  }
  func.func @transform_3(%arg0: i32, %arg1: i32) -> (i32, i32) {
    %c0_i32 = arith.constant 0 : i32
    %c0_i32_0 = arith.constant 0 : i32
    %c0_i32_1 = arith.constant 0 : i32
    return %c0_i32, %c0_i32_0 : i32, i32
  }
  func.func @transform_4(%arg0: i32, %arg1: i32) -> i32 {
    %c0_i32 = arith.constant 0 : i32
    %c0_i32_0 = arith.constant 0 : i32
    return %c0_i32 : i32
  }
  func.func @transform_5(%arg0: i32, %arg1: i32) -> (i32, i32, i32) {
    %c0_i32 = arith.constant 0 : i32
    %c0_i32_0 = arith.constant 0 : i32
    return %arg0, %c0_i32, %arg1 : i32, i32, i32
  }
}

</mosaic_0001>

<bundles_post_ra>
// kernel: tpu_custom_call.1
= control target key start
LH: loop header
LB: loop body
LE: loop exit
PB: predicated region body
PF: predicated region fallthrough
CT: control target
= control target key end

     0   :  { %s1486_s0 = inlined_call_operand.hbm [shape: f32[2,4,128], index: 0, kind: input, shape index: {}]   ;;  %s1487_s1 = inlined_call_operand.hbm [shape: f32[4,4], index: 1, kind: input, shape index: {}]   ;;  %s1488_s2 = inlined_call_operand.hbm [shape: f32[4], index: 2, kind: input, shape index: {}]   ;;  %s1489_s3 = inlined_call_operand.hbm [shape: f32[6,4], index: 3, kind: input, shape index: {}]   ;;  %s1490_s4 = inlined_call_operand.hbm [shape: f32[6], index: 4, kind: input, shape index: {}]   ;;  %s1491_s5 = inlined_call_operand.hbm [shape: f32[2,6,128], index: 5, kind: output, shape index: {}]  }
   0x1   :  { %1496 = sst [smem:[#allocation18_spill]] %s1486_s0 }
   0x2   :  { %1497 = sst [smem:[#allocation19_spill]] %s1487_s1 }
   0x3   :  { %1498 = sst [smem:[#allocation20_spill]] %s1488_s2 }
   0x4   :  { %10 = vsyncpa [#allocation3], 0 }
   0x5   :  { %12 = vsyncpa [#allocation3 + $0x1], 0 }
   0x6   :  { %13 = vsyncpa [#allocation5], 0 }
   0x7   :  { %14 = vsyncpa [#allocation8], 0 }
   0x8   :  { %15 = vsyncpa [#allocation11], 0 }
   0x9   :  { %16 = vsyncpa [#allocation4], 0 }
   0xa   :  { %18 = vsyncpa [#allocation4 + $0x1], 0  ;;  %s1015_s18 = smov 0   ;;  %s1017_s19 = smov 0  }
   0xb   :  { %s1019_s20 = smov 0   ;;  %s1021_s21 = smov 0  }
   0xc   :  { %s1023_s22 = smov 0   ;;  %s1025_s23 = smov 0  }
   0xd LB: > { %s631_s24 = sadd.s32 4294967295, %s977_s23   ;;  %p633_p0 = scmp.ge.s32.totalorder %s977_s23, 1  ;;  %s977_s23 = sphi %s1025_s23, %s24_s23   ;;  %s973_s22 = sphi %s1023_s22, %s1519_s22   ;;  %s969_s21 = sphi %s1021_s21, %s1518_s21   ;;  %s965_s20 = sphi %s1019_s20, %s1517_s20   ;;  %s961_s19 = sphi %s1017_s19, %s1516_s19   ;;  %s957_s18 = sphi %s1015_s18, %s1515_s18  }
   0xe   : > { %p1049_p1 = scmp.eq.s32.totalorder %s631_s24, 0  ;;  %p181_p2 = scmp.lt.s32.totalorder %s977_s23, 3 }
   0xf   : > { %s1502_s2 = sld [smem:[#allocation20_spill]] }
  0x10   : > { %s1499_s25 = scalar_select %p1049_p1, 1, 0 }
  0x11   : > { %p1055_p4 = pnand %p633_p0, %p181_p2 }
  0x13   : > { %p718_p5 = pneg %p1055_p4 }
  0x15   : > { %p1063_p6 = pnand %p718_p5, %p1049_p1  ;;  %s801_s30 = scalar_lea.hbm %s1502_s2, 16 }
  0x16   : > { %p802_p7 = scmp.ne.s32.totalorder %s1502_s2, %s801_s30  ;;  %p808_p11 = scmp.lt.u32.totalorder %s801_s30, %s1502_s2 }
  0x17   : > { %p803_p8 = pneg %p1063_p6 }
  0x19   : > { %p804_p9 = pnand %p803_p8, %p802_p7 }
  0x1b   : > { %p805_p10 = pneg %p804_p9 }
  0x1d   : > { %p810_p12 = pnand %p808_p11, %p805_p10 }
  0x1f   : > { %813 = shalt.err (!%p810_p12)
}
  0x20   : > { %s979_s10 = smov [#allocation7]   ;;  %s1503_s1 = sld [smem:[#allocation19_spill]] }
  0x21   : > { %724 = dma.hbm_to_smem (!%p1063_p6), %s1502_s2, 16, %s979_s10, [#allocation8]  }
  0x26   : > { %s814_s15 = scalar_lea.hbm %s1503_s1, 64 }
  0x27   : > { %p815_p13 = scmp.ne.s32.totalorder %s1503_s1, %s814_s15  ;;  %p821_p5 = scmp.lt.u32.totalorder %s814_s15, %s1503_s1 }
  0x29   : > { %p817_p0 = pnand %p815_p13, %p803_p8 }
  0x2b   : > { %p818_p2 = pneg %p817_p0 }
  0x2d   : > { %p823_p7 = pnand %p821_p5, %p818_p2 }
  0x2f   : > { %826 = shalt.err (!%p823_p7)
}
  0x30   : > { %s980_s30 = smov [#allocation6]   ;;  %s827_s10 = scalar_lea.hbm %s1489_s3, 128 }
  0x31   : > { %721 = dma.hbm_to_smem (!%p1063_p6), %s1503_s1, 64, %s980_s30, [#allocation5]  }
  0x32   : > { %p828_p9 = scmp.ne.s32.totalorder %s1489_s3, %s827_s10  ;;  %p834_p12 = scmp.lt.u32.totalorder %s827_s10, %s1489_s3 }
  0x34   : > { %p830_p10 = pnand %p828_p9, %p803_p8 }
  0x36   : > { %p831_p11 = pneg %p830_p10 }
  0x38   : > { %p836_p13 = pnand %p834_p12, %p831_p11 }
  0x3a   : > { %839 = shalt.err (!%p836_p13)
}
  0x3b   : > { %s981_s15 = smov [#allocation9]   ;;  %s840_s30 = scalar_lea.hbm %s1490_s4, 16 }
  0x3c   : > { %727 = dma.hbm_to_smem (!%p1063_p6), %s1489_s3, 128, %s981_s15, [#allocation8]  }
  0x3d   : > { %p841_p0 = scmp.ne.s32.totalorder %s1490_s4, %s840_s30  ;;  %p847_p7 = scmp.lt.u32.totalorder %s840_s30, %s1490_s4 }
  0x3f   : > { %p843_p2 = pnand %p841_p0, %p803_p8 }
  0x41   : > { %p844_p5 = pneg %p843_p2 }
  0x43   : > { %p849_p9 = pnand %p847_p7, %p844_p5 }
  0x45   : > { %852 = shalt.err (!%p849_p9)
}
  0x46   : > { %s982_s10 = smov [#allocation10]   ;;  %s632_s13 = sadd.s32 4294967294, %s977_s23  }
  0x47   : > { %730 = dma.hbm_to_smem (!%p1063_p6), %s1490_s4, 16, %s982_s10, [#allocation11]  }
  0x48   : > { %s36_s14 = sadd.s32 1, %s973_s22  ;;  %s45_s27 = sadd.s32 1, %s965_s20 }
  0x49   : > { %p38_p8 = scmp.ge.s32.totalorder %s36_s14, 2  ;;  %p52_p10 = scmp.ne.s32.totalorder %s965_s20, %s961_s19 }
  0x4a   : > { %p53_p11 = scmp.eq.s32.totalorder %s977_s23, 0  ;;  %p58_p13 = scmp.ne.s32.totalorder %s961_s19, %s957_s18 }
  0x4b   : > { %s1521_s14 = smov (%p38_p8, %s36_s14), 0  ;;  %p168_p6 = scmp.eq.s32.totalorder %s631_s24, 1 }
  0x4c   : > { %p1145_p12 = por %p53_p11, %p52_p10  ;;  %s40_s16 = ssub.s32 %s973_s22, %s1521_s14 }
  0x4d   : > { %p43_p0 = scmp.eq.s32.totalorder %s40_s16, 0  ;;  %p1157_p2 = por %p1049_p1, %p58_p13 }
  0x4e   : > { %p1161_p5 = por %p168_p6, %p52_p10  ;;  %p174_p7 = scmp.eq.s32.totalorder %s632_s13, 1 }
  0x4f   : > { %s1505_s17 = scalar_select %p1157_p2, 1, 0 }
  0x50   : > { %s1506_s28 = scalar_select %p1161_p5, 1, 0 }
  0x51   : > { %s1166_s29 = scalar_select %p43_p0, %s965_s20, %s45_s27  }
  0x52   : > { %p1168_p9 = por %p174_p7, %p58_p13  ;;  %p743_p8 = scmp.lt.s32.totalorder %s977_s23, 2 }
  0x53   : > { %s230_s6 = sand.u32 1, %s965_s20   ;;  %s640_s24 = sshll.u32 %s973_s22, 6 }
  0x54   : > { %s1507_s30 = scalar_select %p1168_p9, 1, 0 }
  0x55   : > { %s639_s7 = sshll.u32 %s230_s6, 2  ;;  %s1508_s0 = sld [smem:[#allocation18_spill]] }
  0x56   : > { %s234_s11 = scalar_lea.vmem [#allocation2], %s639_s7  ;;  %p1182_p10 = pnand %p743_p8, %p1145_p12 }
  0x57   : > { %s242_s12 = sshll.u32 %s234_s11, 4  ;;  %s231_s27 = scalar_lea.sflag [#allocation3], %s230_s6  ;;  %s1186_s12 = int_to_ptr.vmem [resolvable:$true] %s242_s12 }
  0x58   : > { %p855_p13 = pneg %p1182_p10 }
  0x5b   : > { %s1178_s10 = scalar_lea.hbm %s1508_s0, %s640_s24  ;;  %s858_s15 = scalar_lea.hbm %s1508_s0, 128 }
  0x5c   : > { %s853_s16 = scalar_lea.hbm %s1178_s10, 64  ;;  %p859_p12 = scmp.lt.u32.totalorder %s1178_s10, %s1508_s0 }
  0x5d   : > { %p854_p11 = scmp.ne.s32.totalorder %s1178_s10, %s853_s16  ;;  %p860_p7 = scmp.lt.u32.totalorder %s858_s15, %s853_s16 }
  0x5e   : > { %p862_p3 = scmp.lt.u32.totalorder %s853_s16, %s1178_s10 }
  0x5f   : > { %p856_p6 = pnand %p855_p13, %p854_p11  ;;  %p861_p8 = por %p860_p7, %p859_p12 }
  0x61   : > { %p857_p0 = pneg %p856_p6  ;;  %p863_p9 = por %p862_p3, %p861_p8 }
  0x63   : > { %p864_p5 = pnand %p863_p9, %p857_p0 }
  0x65   : > { %867 = shalt.err (!%p864_p5)
}
  0x66   : > { %s868_s6 = scalar_lea.vmem %s1186_s12, 64  ;;  %s983_s11 = smov [#allocation2]  }
  0x67   : > { %p869_p11 = scmp.ne.s32.totalorder %s1186_s12, %s868_s6  ;;  %s873_s24 = sshll.u32 %s983_s11, 4  ;;  %s874_s24 = int_to_ptr.vmem [resolvable:$false] %s873_s24 }
  0x68   : > { %s875_s7 = scalar_lea.vmem %s874_s24, 128  ;;  %p876_p2 = scmp.lt.s32.totalorder %s1186_s12, %s874_s24 }
  0x69   : > { %p871_p6 = pnand %p869_p11, %p855_p13  ;;  %p877_p12 = scmp.lt.s32.totalorder %s875_s7, %s868_s6 }
  0x6b   : > { %p872_p1 = pneg %p871_p6  ;;  %p878_p7 = por %p877_p12, %p876_p2 }
  0x6d   : > { %p879_p3 = pnand %p878_p7, %p872_p1 }
  0x6f   : > { %882 = shalt.err (!%p879_p3)
}
  0x70   : > { %734 = dma.hbm_to_vmem [thread:$0]  (!%p1182_p10), %s1178_s10, 64, %s1186_s12, %s231_s27  }
  0x71   : > { %251 = sbr.rel (%p1055_p4) target bundleno = 191 (0xbf), region = 40  ;;  %s1216_s16 = sand.u32 (!%p1055_p4), 1, %s961_s19  }
  0x72   : > { %s642_s15 = sshll.u32 (!%p1055_p4), %s1216_s16, 2  ;;  %s254_s8 = scalar_lea.sflag (!%p1055_p4), [#allocation3], %s1216_s16 }
  0x73   : > { %s257_s9 = scalar_lea.vmem (!%p1055_p4), [#allocation2], %s642_s15  ;;  %p1510_p2 = scmp.ne.s32.totalorder (!%p1055_p4), %s1505_s17, 0 }
  0x78   : > { %936 = dma.done.wait (%p1510_p2), %s254_s8, 64  }
  0x79   : > { %938 = vsyncadd (%p1510_p2), %s254_s8, 4294967232  ;;  %p1511_p1 = scmp.ne.s32.totalorder %s1499_s25, 0 }
  0x7b   : > { %940 = dma.done.wait (%p1511_p1), [#allocation5], 64  }
  0x7c   : > { %942 = vsyncadd (%p1511_p1), [#allocation5], 4294967232 }
  0x7d   : > { %944 = dma.done.wait (%p1511_p1), [#allocation8], 144  }
  0x7e   : > { %946 = vsyncadd (%p1511_p1), [#allocation8], 4294967152 }
  0x7f   : > { %948 = dma.done.wait (%p1511_p1), [#allocation11], 16  }
  0x80   : > { %950 = vsyncadd (%p1511_p1), [#allocation11], 4294967280 }
  0x81   : > { %278 = sfence }
  0x82   : > { %s305_s26 = sld [smem:[#allocation6]]  ;;  %s648_s10 = sld [smem:[#allocation6 + $0x1]]  ;;  %v301_v0 = vld [vmem:[%s257_s9] sm:$0x1]  ;;  %v1246_v1 = vld [vmem:[%s257_s9 + $0x1] sm:$0x1] }
  0x83   : > { %s308_s17 = sld [smem:[#allocation7]]  ;;  %s649_s12 = sld [smem:[#allocation6 + $0x2]]  ;;  %v1252_v2 = vld [vmem:[%s257_s9 + $0x2] sm:$0x1]  ;;  %v1258_v5 = vld [vmem:[%s257_s9 + $0x3] sm:$0x1] }
  0x84   : > { %s1236_s13 = sld [smem:[#allocation6 + $0x3]]  ;;  %s651_s27 = sld [smem:[#allocation6 + $0x80]] }
  0x85   : > { %s1238_s6 = sld [smem:[#allocation7 + $0x1]]  ;;  %s1242_s24 = sld [smem:[#allocation6 + $0x82]] }
  0x86   : > { %s1240_s11 = sld [smem:[#allocation6 + $0x81]]  ;;  %s1244_s7 = sld [smem:[#allocation6 + $0x83]] }
  0x87   : > { %s1248_s25 = sld [smem:[#allocation6 + $0x100]]  ;;  %s1250_s15 = sld [smem:[#allocation7 + $0x2]] }
  0x88   : > { %v306_v3 = vstv %s305_s26  ;;  %s1254_s8 = sld [smem:[#allocation6 + $0x101]]  ;;  %s1256_s0 = sld [smem:[#allocation6 + $0x102]]  ;;  %v312_v7 = vstv %s648_s10 }
  0x89   : > { %v309_v4 = vstv %s308_s17  ;;  %v307_v6 = vmul.f32 %v306_v3, %v301_v0  ;;  %v316_v8 = vstv %s649_s12  ;;  %s1260_s1 = sld [smem:[#allocation6 + $0x103]]  ;;  %s1262_s2 = sld [smem:[#allocation6 + $0x180]]  ;;  %v313_v9 = vmul.f32 %v312_v7, %v1246_v1 }
  0x8a   : > { %v320_v10 = vstv %s1236_s13  ;;  %v325_v11 = vstv %s651_s27  ;;  %s1266_s26 = sld [smem:[#allocation7 + $0x3]]  ;;  %s1268_s17 = sld [smem:[#allocation6 + $0x181]]  ;;  %v317_v13 = vmul.f32 %v316_v8, %v1252_v2 }
  0x8b   : > { %v310_v12 = vadd.f32 %v309_v4, %v307_v6  ;;  %v326_v14 = vmul.f32 %v325_v11, %v301_v0  ;;  %v328_v15 = vstv %s1238_s6  ;;  %s1272_s9 = sld [smem:[#allocation6 + $0x182]]  ;;  %v321_v16 = vmul.f32 %v320_v10, %v1258_v5  ;;  %s1278_s10 = sld [smem:[#allocation6 + $0x183]] }
  0x8c   : > { %v331_v17 = vstv %s1240_s11  ;;  %v335_v18 = vstv %s1242_s24  ;;  %v339_v19 = vstv %s1244_s7  ;;  %s1280_s12 = sld [smem:[#allocation9]]  ;;  %s1290_s27 = sld [smem:[#allocation9 + $0x1]] }
  0x8d   : > { %v314_v20 = vadd.f32 %v313_v9, %v310_v12  ;;  %v329_v21 = vadd.f32 %v328_v15, %v326_v14  ;;  %v332_v22 = vmul.f32 %v331_v17, %v1246_v1  ;;  %v336_v23 = vmul.f32 %v335_v18, %v1252_v2  ;;  %s1284_s13 = sld [smem:[#allocation10]]  ;;  %s1292_s6 = sld [smem:[#allocation9 + $0x2]] }
  0x8e   : > { %v340_v24 = vmul.f32 %v339_v19, %v1258_v5  ;;  %v344_v25 = vstv %s1248_s25  ;;  %v347_v26 = vstv %s1250_s15  ;;  %v350_v27 = vstv %s1254_s8  ;;  %s1295_s11 = sld [smem:[#allocation9 + $0x3]]  ;;  %s1297_s24 = sld [smem:[#allocation9 + $0x80]] }
  0x8f   : > { %v318_v28 = vadd.f32 %v317_v13, %v314_v20  ;;  %v333_v29 = vadd.f32 %v332_v22, %v329_v21  ;;  %v345_v30 = vmul.f32 %v344_v25, %v301_v0  ;;  %v351_v31 = vmul.f32 %v350_v27, %v1246_v1  ;;  %s1303_s7 = sld [smem:[#allocation10 + $0x1]]  ;;  %s1308_s15 = sld [smem:[#allocation9 + $0x82]] }
  0x90   : > { %v354_v32 = vstv %s1256_s0  ;;  %v358_v33 = vstv %s1260_s1  ;;  %v363_v34 = vstv %s1262_s2  ;;  %v366_v35 = vstv %s1266_s26  ;;  %s1305_s25 = sld [smem:[#allocation9 + $0x81]]  ;;  %s1313_s0 = sld [smem:[#allocation9 + $0x83]] }
  0x91   : > { %v322_v36 = vadd.f32 %v321_v16, %v318_v28  ;;  %v337_v37 = vadd.f32 %v336_v23, %v333_v29  ;;  %v348_v38 = vadd.f32 %v347_v26, %v345_v30  ;;  %v355_v39 = vmul.f32 %v354_v32, %v1252_v2  ;;  %s1315_s1 = sld [smem:[#allocation9 + $0x100]]  ;;  %s1320_s2 = sld [smem:[#allocation10 + $0x2]] }
  0x92   : > { %v359_v40 = vmul.f32 %v358_v33, %v1258_v5  ;;  %v364_v41 = vmul.f32 %v363_v34, %v301_v0  ;;  %v369_v42 = vstv %s1268_s17  ;;  %v373_v43 = vstv %s1272_s9  ;;  %s1325_s8 = sld [smem:[#allocation9 + $0x101]]  ;;  %s1327_s26 = sld [smem:[#allocation9 + $0x102]] }
  0x93   : > { %v1317_v44 = vmax.f32 %v322_v36, 0.0  ;;  %v341_v45 = vadd.f32 %v340_v24, %v337_v37  ;;  %v352_v46 = vadd.f32 %v351_v31, %v348_v38  ;;  %v370_v47 = vmul.f32 %v369_v42, %v1246_v1  ;;  %s1336_s17 = sld [smem:[#allocation9 + $0x103]]  ;;  %s1340_s9 = sld [smem:[#allocation9 + $0x180]] }
  0x94   : > { %v367_v48 = vadd.f32 %v366_v35, %v364_v41  ;;  %v374_v49 = vmul.f32 %v373_v43, %v1252_v2  ;;  %v377_v50 = vstv %s1278_s10  ;;  %v382_v51 = vstv %s1280_s12  ;;  %s1345_s10 = sld [smem:[#allocation10 + $0x3]]  ;;  %s1347_s12 = sld [smem:[#allocation9 + $0x181]] }
  0x95   : > { %v1329_v52 = vmax.f32 %v341_v45, 0.0  ;;  %v356_v53 = vadd.f32 %v355_v39, %v352_v46  ;;  %v378_v54 = vmul.f32 %v377_v50, %v1258_v5  ;;  %v383_v55 = vmul.f32 %v382_v51, %v1317_v44  ;;  %p1512_p5 = scmp.ne.s32.totalorder %s1506_s28, 0 }
  0x96   : > { %v371_v56 = vadd.f32 %v370_v47, %v367_v48  ;;  %v385_v57 = vstv %s1284_s13  ;;  %v388_v58 = vstv %s1290_s27  ;;  %v392_v59 = vstv %s1292_s6  ;;  %s647_s13 = sshll.u32 %s1216_s16, 3  ;;  %s1354_s27 = sld [smem:[#allocation9 + $0x182]] }
  0x97   : > { %v360_v60 = vadd.f32 %v359_v40, %v356_v53  ;;  %v386_v61 = vadd.f32 %v385_v57, %v383_v55  ;;  %v389_v62 = vmul.f32 %v388_v58, %v1329_v52  ;;  %v396_v63 = vstv %s1295_s11  ;;  %s1359_s6 = sld [smem:[#allocation9 + $0x183]]  ;;  %s1361_s11 = sld [smem:[#allocation9 + $0x200]] }
  0x98   : > { %v375_v0 = vadd.f32 %v374_v49, %v371_v56  ;;  %v401_v1 = vstv %s1297_s24  ;;  %v404_v2 = vstv %s1303_s7  ;;  %v407_v3 = vstv %s1305_s25  ;;  %s1366_s24 = sld [smem:[#allocation10 + $0x4]]  ;;  %s1368_s7 = sld [smem:[#allocation9 + $0x201]] }
  0x99   : > { %v1350_v4 = vmax.f32 %v360_v60, 0.0  ;;  %v390_v5 = vadd.f32 %v389_v62, %v386_v61  ;;  %v402_v6 = vmul.f32 %v401_v1, %v1317_v44  ;;  %v408_v7 = vmul.f32 %v407_v3, %v1329_v52  ;;  %s1375_s25 = sld [smem:[#allocation9 + $0x202]] }
  0x9a   : > { %v379_v8 = vadd.f32 %v378_v54, %v375_v0  ;;  %v411_v9 = vstv %s1308_s15  ;;  %v415_v10 = vstv %s1313_s0  ;;  %v420_v11 = vstv %s1315_s1  ;;  %s1377_s15 = sld [smem:[#allocation9 + $0x203]]  ;;  %s1380_s0 = sld [smem:[#allocation9 + $0x280]] }
  0x9b   : > { %v393_v12 = vmul.f32 %v392_v59, %v1350_v4  ;;  %v405_v13 = vadd.f32 %v404_v2, %v402_v6  ;;  %v412_v14 = vmul.f32 %v411_v9, %v1350_v4  ;;  %v421_v15 = vmul.f32 %v420_v11, %v1317_v44  ;;  %s1386_s1 = sld [smem:[#allocation10 + $0x5]] }
  0x9c   : > { %v1370_v16 = vmax.f32 %v379_v8, 0.0  ;;  %v423_v17 = vstv %s1320_s2  ;;  %v426_v18 = vstv %s1325_s8  ;;  %v430_v19 = vstv %s1327_s26  ;;  %s1388_s2 = sld [smem:[#allocation9 + $0x281]]  ;;  %s1392_s8 = sld [smem:[#allocation9 + $0x282]] }
  0x9d   : > { %v394_v20 = vadd.f32 %v393_v12, %v390_v5  ;;  %v409_v21 = vadd.f32 %v408_v7, %v405_v13  ;;  %v424_v22 = vadd.f32 %v423_v17, %v421_v15  ;;  %v427_v23 = vmul.f32 %v426_v18, %v1329_v52  ;;  %s1397_s26 = sld [smem:[#allocation9 + $0x283]] }
  0x9e   : > { %v397_v24 = vmul.f32 %v396_v63, %v1370_v16  ;;  %v416_v25 = vmul.f32 %v415_v10, %v1370_v16  ;;  %v431_v26 = vmul.f32 %v430_v19, %v1350_v4  ;;  %v434_v27 = vstv %s1336_s17  ;;  %s1403_s17 = scalar_lea.vmem [#allocation12], %s647_s13 }
  0x9f   : > { %v413_v28 = vadd.f32 %v412_v14, %v409_v21  ;;  %v428_v29 = vadd.f32 %v427_v23, %v424_v22  ;;  %v435_v30 = vmul.f32 %v434_v27, %v1370_v16  ;;  %v439_v31 = vstv %s1340_s9  ;;  %s695_s9 = sshll.u32 %s969_s21, 7  ;;  %s984_s21 = smov [#allocation12]  }
  0xa0   : > { %v398_v32 = vadd.f32 %v397_v24, %v394_v20  ;;  %v440_v33 = vmul.f32 %v439_v31, %v1317_v44  ;;  %v442_v34 = vstv %s1345_s10  ;;  %v445_v35 = vstv %s1347_s12  ;;  %s510_s10 = sshll.u32 %s1403_s17, 4  ;;  %s1438_s10 = int_to_ptr.vmem [resolvable:$true] %s510_s10 }
  0xa1   : > { %v417_v36 = vadd.f32 %v416_v25, %v413_v28  ;;  %v432_v37 = vadd.f32 %v431_v26, %v428_v29  ;;  %v446_v38 = vmul.f32 %v445_v35, %v1329_v52  ;;  %v449_v39 = vstv %s1354_s27  ;;  %s1436_s27 = scalar_lea.hbm %s1491_s5, %s695_s9 }
  0xa2   : > { %399 = vst [vmem:[%s1403_s17] sm:$0x1] %v398_v32  ;;  %v443_v40 = vadd.f32 %v442_v34, %v440_v33  ;;  %v450_v41 = vmul.f32 %v449_v39, %v1350_v4  ;;  %v453_v42 = vstv %s1359_s6  ;;  %v458_v43 = vstv %s1361_s11  ;;  %s496_s6 = scalar_lea.sflag [#allocation4], %s1216_s16  ;;  %s883_s11 = scalar_lea.vmem %s1438_s10, 128 }
  0xa3   : > { %418 = vst [vmem:[%s1403_s17 + $0x1] sm:$0x1] %v417_v36  ;;  %v436_v45 = vadd.f32 %v435_v30, %v432_v37  ;;  %v454_v46 = vmul.f32 %v453_v42, %v1370_v16  ;;  %v459_v47 = vmul.f32 %v458_v43, %v1317_v44  ;;  %v461_v48 = vstv %s1366_s24  ;;  %p884_p4 = scmp.ne.s32.totalorder %s1438_s10, %s883_s11  ;;  %s887_s24 = sshll.u32 %s984_s21, 4  ;;  %s888_s24 = int_to_ptr.vmem [resolvable:$false] %s887_s24 }
  0xa4   : > { %v447_v49 = vadd.f32 %v446_v38, %v443_v40  ;;  %v464_v50 = vstv %s1368_s7  ;;  %v468_v51 = vstv %s1375_s25  ;;  %v472_v53 = vstv %s1377_s15  ;;  %s889_s7 = scalar_lea.vmem %s888_s24, 256  ;;  %p890_p13 = scmp.lt.s32.totalorder %s1438_s10, %s888_s24 }
  0xa5   : > { %437 = vst [vmem:[%s1403_s17 + $0x2] sm:$0x1] %v436_v45  ;;  %v462_v54 = vadd.f32 %v461_v48, %v459_v47  ;;  %v465_v55 = vmul.f32 %v464_v50, %v1329_v52  ;;  %v469_v56 = vmul.f32 %v468_v51, %v1350_v4  ;;  %v473_v57 = vmul.f32 %v472_v53, %v1370_v16  ;;  %p885_p9 = pnand %p884_p4, %p1512_p5  ;;  %p891_p0 = scmp.lt.s32.totalorder %s889_s7, %s883_s11 }
  0xa6   : > { %v451_v58 = vadd.f32 %v450_v41, %v447_v49  ;;  %v477_v59 = vstv %s1380_s0  ;;  %v480_v60 = vstv %s1386_s1  ;;  %v483_v61 = vstv %s1388_s2 }
  0xa7   : > { %v466_v62 = vadd.f32 %v465_v55, %v462_v54  ;;  %v478_v63 = vmul.f32 %v477_v59, %v1317_v44  ;;  %v484_v0 = vmul.f32 %v483_v61, %v1329_v52  ;;  %v487_v1 = vstv %s1392_s8  ;;  %p886_p10 = pneg %p885_p9  ;;  %p892_p8 = por %p891_p0, %p890_p13 }
  0xa8   : > { %v455_v2 = vadd.f32 %v454_v46, %v451_v58  ;;  %v491_v3 = vstv %s1397_s26  ;;  %v488_v7 = vmul.f32 %v487_v1, %v1350_v4 }
  0xa9   : > { %v470_v5 = vadd.f32 %v469_v56, %v466_v62  ;;  %v481_v6 = vadd.f32 %v480_v60, %v478_v63  ;;  %v492_v10 = vmul.f32 %v491_v3, %v1370_v16  ;;  %p893_p11 = pnand %p892_p8, %p886_p10 }
  0xaa   : > { %456 = vst [vmem:[%s1403_s17 + $0x3] sm:$0x1] %v455_v2 }
  0xab   : > { %v474_v8 = vadd.f32 %v473_v57, %v470_v5  ;;  %v485_v9 = vadd.f32 %v484_v0, %v481_v6 }
  0xad   : > { %475 = vst [vmem:[%s1403_s17 + $0x4] sm:$0x1] %v474_v8  ;;  %v489_v44 = vadd.f32 %v488_v7, %v485_v9 }
  0xaf   : > { %v493_v52 = vadd.f32 %v492_v10, %v489_v44 }
  0xb1   : > { %494 = vst [vmem:[%s1403_s17 + $0x5] sm:$0x1] %v493_v52 }
  0xb2   : > { %896 = shalt.err (!%p893_p11)
}
  0xb3   : > { %s897_s16 = scalar_lea.hbm %s1436_s27, 128  ;;  %s901_s0 = scalar_lea.hbm %s1491_s5, 256 }
  0xb4   : > { %p898_p6 = scmp.ne.s32.totalorder %s1436_s27, %s897_s16  ;;  %p902_p3 = scmp.lt.u32.totalorder %s1436_s27, %s1491_s5 }
  0xb5   : > { %p903_p2 = scmp.lt.u32.totalorder %s901_s0, %s897_s16  ;;  %p905_p4 = scmp.lt.u32.totalorder %s897_s16, %s1436_s27 }
  0xb6   : > { %p899_p12 = pnand %p898_p6, %p1512_p5 }
  0xb7   : > { %p904_p1 = por %p903_p2, %p902_p3 }
  0xb8   : > { %p900_p7 = pneg %p899_p12 }
  0xb9   : > { %p906_p9 = por %p905_p4, %p904_p1 }
  0xbb   : > { %p907_p10 = pnand %p906_p9, %p900_p7 }
  0xbd   : > { %910 = shalt.err (!%p907_p10)
}
  0xbe   : > { %716 = dma.vmem_to_hbm [thread:$0]  (%p1512_p5), %s1438_s10, 128, %s1436_s27, %s496_s6  }
  0xbf PF: > { %s522_s8 = sand.u32 1, %s957_s18   ;;  %p1513_p13 = scmp.ne.s32.totalorder %s1507_s30, 0 }
  0xc0   : > { %p1514_p0 = scmp.ge.s32.totalorder %s977_s23, 2  ;;  %s523_s26 = scalar_lea.sflag [#allocation4], %s522_s8 }
  0xc2   : > { %p736_p8 = pnand %p1514_p0, %p1513_p13 }
  0xc4   : > { %952 = dma.done.wait (!%p736_p8), %s523_s26, 128  }
  0xc5   : > { %954 = vsyncadd (!%p736_p8), %s523_s26, 4294967168  ;;  %s24_s23 = sadd.s32 1, %s977_s23   ;;  %s1515_s18 = smov %s961_s19 }
  0xc6   : > { %p21_p11 = scmp.ge.s32.totalorder %s24_s23, 4   ;;  %s1516_s19 = smov %s965_s20 }
  0xc7   : > { %s1517_s20 = smov %s1166_s29  ;;  %s1518_s21 = smov %s973_s22 }
  0xc8   : > { %s1519_s22 = smov %s1521_s14  ;;  %23 = sbr.rel (!%p21_p11) target bundleno = 13 (0xd), region = 102 }
  0xcf   :  { %528 = vsyncpa [#allocation3], 1 }
  0xd0   :  { %530 = vsyncpa [#allocation3 + $0x1], 1 }
  0xd1   :  { %531 = vsyncpa [#allocation4], 1 }
  0xd2   :  { %533 = vsyncpa [#allocation4 + $0x1], 1 }
  0xd3   :  { %534 = vsyncpa [#allocation5], 1 }
  0xd4   :  { %536 = vsyncpa [#allocation5 + $0x1], 1 }
  0xd5   :  { %537 = vsyncpa [#allocation8], 1 }
  0xd6   :  { %538 = vsyncpa [#allocation11], 1 }

</bundles_post_ra>
